<compile_context>
chip_gen: v5e
topology: v5e:2x2
jax: 0.10.0
libtpu: 0.0.40
codegen_flags: <defaults>
</compile_context>

<pallas_src>
import functools

import jax
import jax.numpy as jnp
from jax import lax
from jax.experimental import pallas as pl
from jax.experimental.pallas import tpu as pltpu


# -----------------------------------------------------------------------------
# helpers
# -----------------------------------------------------------------------------
def _pick_tile(dim, candidates):
    """Largest candidate that evenly divides `dim`; else the full dim."""
    for c in candidates:
        if c <= dim and dim % c == 0:
            return c
    return dim


def _vmem_limit(nbytes):
    # Explicit scoped-VMEM budget (review item): floor 16 MiB, cap 48 MiB so the
    # same choice stays safe on v7x (64 MiB physical VMEM).
    return int(min(max(int(nbytes), 16 << 20), 48 << 20))


# -----------------------------------------------------------------------------
# Kernel 1: fused LSTM (gate order i,f,g,o) + Linear projection
# -----------------------------------------------------------------------------
def _lstm_linear_kernel(x_ref, wih_ref, whh_ref, b_ref, wlin_ref, blin_ref,
                        o_ref, h_ref, c_ref):
    t = pl.program_id(0)

    @pl.when(t == 0)
    def _():
        h_ref[...] = jnp.zeros_like(h_ref)
        c_ref[...] = jnp.zeros_like(c_ref)

    x_t = x_ref[0].astype(jnp.float32)        # (NB, F)
    h = h_ref[...]                            # (NB, H) f32 carry
    c = c_ref[...]                            # (NB, H) f32 carry

    def gate(k):  # k is a static Python int -> per-gate weight slab
        return (jnp.dot(x_t, wih_ref[k].astype(jnp.float32),
                        preferred_element_type=jnp.float32)
                + jnp.dot(h, whh_ref[k].astype(jnp.float32),
                          preferred_element_type=jnp.float32)
                + b_ref[k].astype(jnp.float32))

    i_g = jax.nn.sigmoid(gate(0))
    f_g = jax.nn.sigmoid(gate(1))
    g_g = jnp.tanh(gate(2))
    o_g = jax.nn.sigmoid(gate(3))

    c_new = f_g * c + i_g * g_g
    h_new = o_g * jnp.tanh(c_new)
    c_ref[...] = c_new
    h_ref[...] = h_new

    y = (jnp.dot(h_new, wlin_ref[...].astype(jnp.float32),
                 preferred_element_type=jnp.float32)
         + blin_ref[...].astype(jnp.float32))
    o_ref[0] = y.astype(o_ref.dtype)


def lstm_linear(x, w_ih, w_hh, b_ih, b_hh, w_lin, b_lin):
    """x: (NB, T, F) -> (NB, T, C).

    Single-layer unidirectional LSTM with PyTorch-layout weights
    (w_ih (4H,F), w_hh (4H,H), biases (4H,), gates i,f,g,o) fused with
    Linear(H -> C) (weight (C,H), bias (C,)).
    """
    NB, T, F = x.shape
    H = w_hh.shape[1]
    C = w_lin.shape[0]
    itemsize = x.dtype.itemsize

    # Layout plumbing stays in the wrapper (cheap XLA transposes).
    x_tm = jnp.transpose(x, (1, 0, 2))                          # (T, NB, F)
    wih_g = jnp.transpose(w_ih.reshape(4, H, F), (0, 2, 1))     # (4, F, H)
    whh_g = jnp.transpose(w_hh.reshape(4, H, H), (0, 2, 1))     # (4, H, H)
    b_g = (b_ih + b_hh).reshape(4, 1, H)
    wlin_t = jnp.transpose(w_lin)                               # (H, C)
    blin = b_lin.reshape(1, C)

    w_bytes = (4 * F * H + 4 * H * H + 4 * H + H * C + C) * itemsize
    vmem_bytes = _vmem_limit(2 * w_bytes
                             + 2 * 2 * NB * (F + C) * itemsize   # streamed x/out
                             + 2 * NB * H * 4 + (2 << 20))       # h/c + margin

    out_tm = pl.pallas_call(
        _lstm_linear_kernel,
        out_shape=jax.ShapeDtypeStruct((T, NB, C), x.dtype),
        grid_spec=pltpu.PrefetchScalarGridSpec(
            num_scalar_prefetch=0,
            grid=(T,),
            in_specs=[
                pl.BlockSpec((1, NB, F), lambda t: (t, 0, 0)),   # streamed x_t
                pl.BlockSpec((4, F, H), lambda t: (0, 0, 0)),    # resident W_ih
                pl.BlockSpec((4, H, H), lambda t: (0, 0, 0)),    # resident W_hh
                pl.BlockSpec((4, 1, H), lambda t: (0, 0, 0)),    # resident bias
                pl.BlockSpec((H, C), lambda t: (0, 0)),          # resident W_lin
                pl.BlockSpec((1, C), lambda t: (0, 0)),          # resident b_lin
            ],
            out_specs=pl.BlockSpec((1, NB, C), lambda t: (t, 0, 0)),
            scratch_shapes=[
                pltpu.VMEM((NB, H), jnp.float32),   # h carry
                pltpu.VMEM((NB, H), jnp.float32),   # c carry
            ],
        ),
        compiler_params=pltpu.CompilerParams(
            dimension_semantics=("arbitrary",),     # true recurrence: sequential
            vmem_limit_bytes=vmem_bytes,
        ),
        cost_estimate=pl.CostEstimate(
            flops=int(2 * T * NB * (4 * F * H + 4 * H * H + H * C)
                      + 10 * T * NB * H),
            transcendentals=int(5 * T * NB * H),
            bytes_accessed=int(T * NB * (F + C) * itemsize + w_bytes),
        ),
    )(x_tm, wih_g, whh_g, b_g, wlin_t, blin)

    return jnp.transpose(out_tm, (1, 0, 2))                     # (NB, T, C)


# -----------------------------------------------------------------------------
# Kernel 2: GroupNorm(1, C) with fused affine + residual add (elementwise)
# -----------------------------------------------------------------------------
def _norm_add_kernel(x_ref, res_ref, scale_ref, shift_ref, o_ref):
    # Purely elementwise: y = x * scale + shift + residual  (per-row scale/shift)
    o_ref[...] = (x_ref[...] * scale_ref[...] + shift_ref[...]
                  + res_ref[...]).astype(o_ref.dtype)


def group_norm_residual(x, gamma, beta, residual, eps=1e-8):
    """nn.GroupNorm(1, C, eps) with affine, fused with `+ residual`.

    x, residual: (B, C, *spatial). Stats over everything but batch; per-channel
    gamma/beta. Stats are a tiny precomputed reduction; the Pallas kernel is a
    lane-dense elementwise normalize over a (B*C, spatial) slab.
    """
    B, C = x.shape[0], x.shape[1]
    S = 1
    for d in x.shape[2:]:
        S *= d
    R = B * C
    itemsize = x.dtype.itemsize

    x2 = x.reshape(R, S)
    r2 = residual.reshape(R, S)

    # Per-sample stats (two-pass, f32) computed outside the kernel (per review).
    xf = x.reshape(B, C * S).astype(jnp.float32)
    mean = jnp.mean(xf, axis=1, keepdims=True)                      # (B, 1)
    var = jnp.mean(jnp.square(xf - mean), axis=1, keepdims=True)    # biased var
    rstd = lax.rsqrt(var + eps)                                     # (B, 1)

    # Fold affine into per-(sample, channel) scale/shift -> 2 VPU ops / element.
    g = gamma.reshape(1, C).astype(jnp.float32)
    b = beta.reshape(1, C).astype(jnp.float32)
    scale = (g * rstd).reshape(R, 1)
    shift = (b - mean * g * rstd).reshape(R, 1)

    # Lane-dense tiling: rows = B*C on sublanes, spatial on lanes (128-multiples).
    TR = _pick_tile(R, (256, 128, 64, 32, 16, 8))
    TS = _pick_tile(S, (2048, 1024, 512, 256, 128))
    grid = (R // TR, S // TS)

    blk = TR * TS * itemsize
    vmem_bytes = _vmem_limit(3 * 2 * blk + 2 * 2 * TR * 4 + (2 << 20))

    out = pl.pallas_call(
        _norm_add_kernel,
        out_shape=jax.ShapeDtypeStruct((R, S), x.dtype),
        grid_spec=pltpu.PrefetchScalarGridSpec(
            num_scalar_prefetch=0,
            grid=grid,
            in_specs=[
                pl.BlockSpec((TR, TS), lambda r, s: (r, s)),
                pl.BlockSpec((TR, TS), lambda r, s: (r, s)),
                pl.BlockSpec((TR, 1), lambda r, s: (r, 0)),   # re-fetched only per row-tile
                pl.BlockSpec((TR, 1), lambda r, s: (r, 0)),
            ],
            out_specs=pl.BlockSpec((TR, TS), lambda r, s: (r, s)),
        ),
        compiler_params=pltpu.CompilerParams(
            dimension_semantics=("parallel", "parallel"),
            vmem_limit_bytes=vmem_bytes,
        ),
        cost_estimate=pl.CostEstimate(
            flops=int(3 * R * S),
            transcendentals=0,
            bytes_accessed=int(3 * R * S * itemsize + 2 * R * 4),
        ),
    )(x2, r2, scale, shift)

    return out.reshape(x.shape)


# -----------------------------------------------------------------------------
# Dual_RNN_Block forward (Pallas-backed)
# -----------------------------------------------------------------------------
def dual_rnn_block(x, p, eps=1e-8):
    """x: [B, N, K, S] -> [B, N, K, S] (matches the PyTorch forward)."""
    B, N, K, S = x.shape

    # ---- intra: RNN along K for each (b, s) ----
    intra = jnp.transpose(x, (0, 3, 2, 1)).reshape(B * S, K, N)
    intra = lstm_linear(intra, *p["intra_rnn"], p["intra_lin_w"], p["intra_lin_b"])
    intra = jnp.transpose(intra.reshape(B, S, K, N), (0, 3, 2, 1))
    intra = group_norm_residual(intra, p["intra_gamma"], p["intra_beta"], x, eps)

    # ---- inter: RNN along S for each (b, k) ----
    inter = jnp.transpose(intra, (0, 2, 3, 1)).reshape(B * K, S, N)
    inter = lstm_linear(inter, *p["inter_rnn"], p["inter_lin_w"], p["inter_lin_b"])
    inter = jnp.transpose(inter.reshape(B, K, S, N), (0, 3, 1, 2))
    return group_norm_residual(inter, p["inter_gamma"], p["inter_beta"], intra, eps)


# -----------------------------------------------------------------------------
# Pure-JAX reference (mirrors the PyTorch module) for validation
# -----------------------------------------------------------------------------
def _dual_rnn_block_ref(x, p, eps=1e-8):
    B, N, K, S = x.shape
    dot_hi = functools.partial(jnp.dot, precision=lax.Precision.HIGHEST)

    def lstm(seq, w_ih, w_hh, b_ih, b_hh):
        NB, T, F = seq.shape
        Hh = w_hh.shape[1]

        def step(carry, xt):
            h, c = carry
            gates = dot_hi(xt, w_ih.T) + dot_hi(h, w_hh.T) + b_ih + b_hh
            i = jax.nn.sigmoid(gates[:, 0:Hh])
            f = jax.nn.sigmoid(gates[:, Hh:2 * Hh])
            g = jnp.tanh(gates[:, 2 * Hh:3 * Hh])
            o = jax.nn.sigmoid(gates[:, 3 * Hh:4 * Hh])
            c = f * c + i * g
            h = o * jnp.tanh(c)
            return (h, c), h

        h0 = jnp.zeros((NB, Hh), jnp.float32)
        _, hs = lax.scan(step, (h0, h0), jnp.transpose(seq, (1, 0, 2)))
        return jnp.transpose(hs, (1, 0, 2))

    def gnorm(v, gamma, beta):
        vf = v.reshape(B, -1)
        mean = jnp.mean(vf, axis=1, keepdims=True)
        var = jnp.mean(jnp.square(vf - mean), axis=1, keepdims=True)
        vn = (v - mean.reshape(B, 1, 1, 1)) / jnp.sqrt(var.reshape(B, 1, 1, 1) + eps)
        return gamma.reshape(1, N, 1, 1) * vn + beta.reshape(1, N, 1, 1)

    intra = jnp.transpose(x, (0, 3, 2, 1)).reshape(B * S, K, N)
    intra = lstm(intra, *p["intra_rnn"])
    intra = dot_hi(intra, p["intra_lin_w"].T) + p["intra_lin_b"]
    intra = jnp.transpose(intra.reshape(B, S, K, N), (0, 3, 2, 1))
    intra = gnorm(intra, p["intra_gamma"], p["intra_beta"]) + x

    inter = jnp.transpose(intra, (0, 2, 3, 1)).reshape(B * K, S, N)
    inter = lstm(inter, *p["inter_rnn"])
    inter = dot_hi(inter, p["inter_lin_w"].T) + p["inter_lin_b"]
    inter = jnp.transpose(inter.reshape(B, K, S, N), (0, 3, 1, 2))
    return gnorm(inter, p["inter_gamma"], p["inter_beta"]) + intra


# -----------------------------------------------------------------------------
if __name__ == "__main__":
    key = jax.random.PRNGKey(0)
    B, N, K, S, H = 2, 4, 16, 16, 32        # x: [B, N, K, S]; hidden_channels = 32
    ks = jax.random.split(key, 11)

    x = jax.random.normal(ks[0], (B, N, K, S), dtype=jnp.float32)

    def lstm_params(k, in_dim, hid):
        k1, k2, k3, k4 = jax.random.split(k, 4)
        s = 1.0 / (hid ** 0.5)
        return (jax.random.uniform(k1, (4 * hid, in_dim), jnp.float32, -s, s),
                jax.random.uniform(k2, (4 * hid, hid), jnp.float32, -s, s),
                jax.random.uniform(k3, (4 * hid,), jnp.float32, -s, s),
                jax.random.uniform(k4, (4 * hid,), jnp.float32, -s, s))

    sl = 1.0 / (H ** 0.5)
    params = {
        "intra_rnn": lstm_params(ks[1], N, H),
        "inter_rnn": lstm_params(ks[2], N, H),
        "intra_lin_w": jax.random.uniform(ks[3], (N, H), jnp.float32, -sl, sl),
        "intra_lin_b": jax.random.uniform(ks[4], (N,), jnp.float32, -sl, sl),
        "inter_lin_w": jax.random.uniform(ks[5], (N, H), jnp.float32, -sl, sl),
        "inter_lin_b": jax.random.uniform(ks[6], (N,), jnp.float32, -sl, sl),
        "intra_gamma": 1.0 + 0.1 * jax.random.normal(ks[7], (N,), jnp.float32),
        "intra_beta": 0.1 * jax.random.normal(ks[8], (N,), jnp.float32),
        "inter_gamma": 1.0 + 0.1 * jax.random.normal(ks[9], (N,), jnp.float32),
        "inter_beta": 0.1 * jax.random.normal(ks[10], (N,), jnp.float32),
    }

    out = jax.jit(dual_rnn_block)(x, params)
    out = jax.block_until_ready(out)

    ref = _dual_rnn_block_ref(x, params)
    assert out.shape == (B, N, K, S)
    assert jnp.allclose(out, ref, atol=3e-3, rtol=3e-3), "mismatch vs JAX reference"
    print("KERNEL_OK")
</pallas_src>

<mosaic_0001>
module attributes {stable_mosaic.version = 11 : i64} {
  func.func @_lstm_linear_kernel(%arg0: i32, %arg1: memref<1x32x4xf32, #tpu.memory_space<vmem>>, %arg2: memref<4x4x32xf32, #tpu.memory_space<vmem>>, %arg3: memref<4x32x32xf32, #tpu.memory_space<vmem>>, %arg4: memref<4x1x32xf32, #tpu.memory_space<vmem>>, %arg5: memref<32x4xf32, #tpu.memory_space<vmem>>, %arg6: memref<1x4xf32, #tpu.memory_space<vmem>>, %arg7: memref<1x32x4xf32, #tpu.memory_space<vmem>>, %arg8: memref<32x32xf32, #tpu.memory_space<vmem>>, %arg9: memref<32x32xf32, #tpu.memory_space<vmem>>) attributes {dimension_semantics = [#tpu.dimension_semantics<arbitrary>], iteration_bounds = array<i64: 16>, scalar_prefetch = 0 : i64, scratch_operands = 2 : i64, tpu.core_type = #tpu.core_type<tc>, window_params = [{transform_indices = @transform_0, window_bounds = array<i64: 1, 32, 4>}, {pipeline_mode = #tpu.pipeline_mode<synchronous>, transform_indices = @transform_1, window_bounds = array<i64: 4, 4, 32>}, {pipeline_mode = #tpu.pipeline_mode<synchronous>, transform_indices = @transform_2, window_bounds = array<i64: 4, 32, 32>}, {pipeline_mode = #tpu.pipeline_mode<synchronous>, transform_indices = @transform_3, window_bounds = array<i64: 4, 1, 32>}, {pipeline_mode = #tpu.pipeline_mode<synchronous>, transform_indices = @transform_4, window_bounds = array<i64: 32, 4>}, {pipeline_mode = #tpu.pipeline_mode<synchronous>, transform_indices = @transform_5, window_bounds = array<i64: 1, 4>}, {transform_indices = @transform_6, window_bounds = array<i64: 1, 32, 4>}]} {
    %c0_i32 = arith.constant 0 : i32
    %0 = arith.cmpi eq, %arg0, %c0_i32 : i32
    %1 = arith.extui %0 : i1 to i32
    %c0_i32_0 = arith.constant 0 : i32
    %2 = arith.cmpi ne, %1, %c0_i32_0 : i32
    scf.if %2 {
      %cst_62 = arith.constant 0.000000e+00 : f32
      %82 = vector.broadcast %cst_62 : f32 to vector<32x32xf32>
      %c0_63 = arith.constant 0 : index
      %c0_64 = arith.constant 0 : index
      %83 = vector.load %arg8[%c0_63, %c0_64] : memref<32x32xf32, #tpu.memory_space<vmem>>, vector<32x32xf32>
      tpu.vector_store %arg8[%c0_63, %c0_64], %82 {strides = array<i32>} : memref<32x32xf32, #tpu.memory_space<vmem>>, vector<32x32xf32>,
      %cst_65 = arith.constant 0.000000e+00 : f32
      %84 = vector.broadcast %cst_65 : f32 to vector<32x32xf32>
      %c0_66 = arith.constant 0 : index
      %c0_67 = arith.constant 0 : index
      %85 = vector.load %arg9[%c0_66, %c0_67] : memref<32x32xf32, #tpu.memory_space<vmem>>, vector<32x32xf32>
      tpu.vector_store %arg9[%c0_66, %c0_67], %84 {strides = array<i32>} : memref<32x32xf32, #tpu.memory_space<vmem>>, vector<32x32xf32>,
    } else {
    }
    %c0 = arith.constant 0 : index
    %c0_1 = arith.constant 0 : index
    %c0_2 = arith.constant 0 : index
    %3 = vector.load %arg1[%c0, %c0_1, %c0_2] : memref<1x32x4xf32, #tpu.memory_space<vmem>>, vector<1x32x4xf32>
    %4 = vector.shape_cast %3 : vector<1x32x4xf32> to vector<32x4xf32>
    %c0_3 = arith.constant 0 : index
    %c0_4 = arith.constant 0 : index
    %5 = vector.load %arg8[%c0_3, %c0_4] : memref<32x32xf32, #tpu.memory_space<vmem>>, vector<32x32xf32>
    %c0_5 = arith.constant 0 : index
    %c0_6 = arith.constant 0 : index
    %6 = vector.load %arg9[%c0_5, %c0_6] : memref<32x32xf32, #tpu.memory_space<vmem>>, vector<32x32xf32>
    %c0_7 = arith.constant 0 : index
    %c0_8 = arith.constant 0 : index
    %c0_9 = arith.constant 0 : index
    %7 = vector.load %arg2[%c0_7, %c0_8, %c0_9] : memref<4x4x32xf32, #tpu.memory_space<vmem>>, vector<1x4x32xf32>
    %8 = vector.shape_cast %7 : vector<1x4x32xf32> to vector<4x32xf32>
    %cst = arith.constant dense<0.000000e+00> : vector<32x32xf32>
    %9 = tpu.matmul %4, %8, %cst {dimension_numbers = #tpu.dot_dimension_numbers<[1], [0], [0], [1], [0, 0, 1, 1], [], []>} : vector<32x4xf32>, vector<4x32xf32>, vector<32x32xf32> -> vector<32x32xf32>
    %c0_10 = arith.constant 0 : index
    %c0_11 = arith.constant 0 : index
    %c0_12 = arith.constant 0 : index
    %10 = vector.load %arg3[%c0_10, %c0_11, %c0_12] : memref<4x32x32xf32, #tpu.memory_space<vmem>>, vector<1x32x32xf32>
    %11 = vector.shape_cast %10 : vector<1x32x32xf32> to vector<32x32xf32>
    %cst_13 = arith.constant dense<0.000000e+00> : vector<32x32xf32>
    %12 = tpu.matmul %5, %11, %cst_13 {dimension_numbers = #tpu.dot_dimension_numbers<[1], [0], [0], [1], [0, 0, 1, 1], [], []>} : vector<32x32xf32>, vector<32x32xf32>, vector<32x32xf32> -> vector<32x32xf32>
    %13 = arith.addf %9, %12 : vector<32x32xf32>
    %c0_14 = arith.constant 0 : index
    %c0_15 = arith.constant 0 : index
    %c0_16 = arith.constant 0 : index
    %14 = vector.load %arg4[%c0_14, %c0_15, %c0_16] : memref<4x1x32xf32, #tpu.memory_space<vmem>>, vector<1x1x32xf32>
    %15 = vector.shape_cast %14 : vector<1x1x32xf32> to vector<1x32xf32>
    %16 = vector.broadcast %15 : vector<1x32xf32> to vector<32x32xf32>
    %17 = arith.addf %13, %16 : vector<32x32xf32>
    %18 = arith.negf %17 : vector<32x32xf32>
    %19 = math.exp %18 : vector<32x32xf32>
    %cst_17 = arith.constant 1.000000e+00 : f32
    %20 = vector.broadcast %cst_17 : f32 to vector<32x32xf32>
    %21 = arith.addf %20, %19 : vector<32x32xf32>
    %22 = arith.divf %20, %21 : vector<32x32xf32>
    %c1 = arith.constant 1 : index
    %c0_18 = arith.constant 0 : index
    %c0_19 = arith.constant 0 : index
    %23 = vector.load %arg2[%c1, %c0_18, %c0_19] : memref<4x4x32xf32, #tpu.memory_space<vmem>>, vector<1x4x32xf32>
    %24 = vector.shape_cast %23 : vector<1x4x32xf32> to vector<4x32xf32>
    %cst_20 = arith.constant dense<0.000000e+00> : vector<32x32xf32>
    %25 = tpu.matmul %4, %24, %cst_20 {dimension_numbers = #tpu.dot_dimension_numbers<[1], [0], [0], [1], [0, 0, 1, 1], [], []>} : vector<32x4xf32>, vector<4x32xf32>, vector<32x32xf32> -> vector<32x32xf32>
    %c1_21 = arith.constant 1 : index
    %c0_22 = arith.constant 0 : index
    %c0_23 = arith.constant 0 : index
    %26 = vector.load %arg3[%c1_21, %c0_22, %c0_23] : memref<4x32x32xf32, #tpu.memory_space<vmem>>, vector<1x32x32xf32>
    %27 = vector.shape_cast %26 : vector<1x32x32xf32> to vector<32x32xf32>
    %cst_24 = arith.constant dense<0.000000e+00> : vector<32x32xf32>
    %28 = tpu.matmul %5, %27, %cst_24 {dimension_numbers = #tpu.dot_dimension_numbers<[1], [0], [0], [1], [0, 0, 1, 1], [], []>} : vector<32x32xf32>, vector<32x32xf32>, vector<32x32xf32> -> vector<32x32xf32>
    %29 = arith.addf %25, %28 : vector<32x32xf32>
    %c1_25 = arith.constant 1 : index
    %c0_26 = arith.constant 0 : index
    %c0_27 = arith.constant 0 : index
    %30 = vector.load %arg4[%c1_25, %c0_26, %c0_27] : memref<4x1x32xf32, #tpu.memory_space<vmem>>, vector<1x1x32xf32>
    %31 = vector.shape_cast %30 : vector<1x1x32xf32> to vector<1x32xf32>
    %32 = vector.broadcast %31 : vector<1x32xf32> to vector<32x32xf32>
    %33 = arith.addf %29, %32 : vector<32x32xf32>
    %34 = arith.negf %33 : vector<32x32xf32>
    %35 = math.exp %34 : vector<32x32xf32>
    %cst_28 = arith.constant 1.000000e+00 : f32
    %36 = vector.broadcast %cst_28 : f32 to vector<32x32xf32>
    %37 = arith.addf %36, %35 : vector<32x32xf32>
    %38 = arith.divf %36, %37 : vector<32x32xf32>
    %c2 = arith.constant 2 : index
    %c0_29 = arith.constant 0 : index
    %c0_30 = arith.constant 0 : index
    %39 = vector.load %arg2[%c2, %c0_29, %c0_30] : memref<4x4x32xf32, #tpu.memory_space<vmem>>, vector<1x4x32xf32>
    %40 = vector.shape_cast %39 : vector<1x4x32xf32> to vector<4x32xf32>
    %cst_31 = arith.constant dense<0.000000e+00> : vector<32x32xf32>
    %41 = tpu.matmul %4, %40, %cst_31 {dimension_numbers = #tpu.dot_dimension_numbers<[1], [0], [0], [1], [0, 0, 1, 1], [], []>} : vector<32x4xf32>, vector<4x32xf32>, vector<32x32xf32> -> vector<32x32xf32>
    %c2_32 = arith.constant 2 : index
    %c0_33 = arith.constant 0 : index
    %c0_34 = arith.constant 0 : index
    %42 = vector.load %arg3[%c2_32, %c0_33, %c0_34] : memref<4x32x32xf32, #tpu.memory_space<vmem>>, vector<1x32x32xf32>
    %43 = vector.shape_cast %42 : vector<1x32x32xf32> to vector<32x32xf32>
    %cst_35 = arith.constant dense<0.000000e+00> : vector<32x32xf32>
    %44 = tpu.matmul %5, %43, %cst_35 {dimension_numbers = #tpu.dot_dimension_numbers<[1], [0], [0], [1], [0, 0, 1, 1], [], []>} : vector<32x32xf32>, vector<32x32xf32>, vector<32x32xf32> -> vector<32x32xf32>
    %45 = arith.addf %41, %44 : vector<32x32xf32>
    %c2_36 = arith.constant 2 : index
    %c0_37 = arith.constant 0 : index
    %c0_38 = arith.constant 0 : index
    %46 = vector.load %arg4[%c2_36, %c0_37, %c0_38] : memref<4x1x32xf32, #tpu.memory_space<vmem>>, vector<1x1x32xf32>
    %47 = vector.shape_cast %46 : vector<1x1x32xf32> to vector<1x32xf32>
    %48 = vector.broadcast %47 : vector<1x32xf32> to vector<32x32xf32>
    %49 = arith.addf %45, %48 : vector<32x32xf32>
    %50 = math.tanh %49 : vector<32x32xf32>
    %c3 = arith.constant 3 : index
    %c0_39 = arith.constant 0 : index
    %c0_40 = arith.constant 0 : index
    %51 = vector.load %arg2[%c3, %c0_39, %c0_40] : memref<4x4x32xf32, #tpu.memory_space<vmem>>, vector<1x4x32xf32>
    %52 = vector.shape_cast %51 : vector<1x4x32xf32> to vector<4x32xf32>
    %cst_41 = arith.constant dense<0.000000e+00> : vector<32x32xf32>
    %53 = tpu.matmul %4, %52, %cst_41 {dimension_numbers = #tpu.dot_dimension_numbers<[1], [0], [0], [1], [0, 0, 1, 1], [], []>} : vector<32x4xf32>, vector<4x32xf32>, vector<32x32xf32> -> vector<32x32xf32>
    %c3_42 = arith.constant 3 : index
    %c0_43 = arith.constant 0 : index
    %c0_44 = arith.constant 0 : index
    %54 = vector.load %arg3[%c3_42, %c0_43, %c0_44] : memref<4x32x32xf32, #tpu.memory_space<vmem>>, vector<1x32x32xf32>
    %55 = vector.shape_cast %54 : vector<1x32x32xf32> to vector<32x32xf32>
    %cst_45 = arith.constant dense<0.000000e+00> : vector<32x32xf32>
    %56 = tpu.matmul %5, %55, %cst_45 {dimension_numbers = #tpu.dot_dimension_numbers<[1], [0], [0], [1], [0, 0, 1, 1], [], []>} : vector<32x32xf32>, vector<32x32xf32>, vector<32x32xf32> -> vector<32x32xf32>
    %57 = arith.addf %53, %56 : vector<32x32xf32>
    %c3_46 = arith.constant 3 : index
    %c0_47 = arith.constant 0 : index
    %c0_48 = arith.constant 0 : index
    %58 = vector.load %arg4[%c3_46, %c0_47, %c0_48] : memref<4x1x32xf32, #tpu.memory_space<vmem>>, vector<1x1x32xf32>
    %59 = vector.shape_cast %58 : vector<1x1x32xf32> to vector<1x32xf32>
    %60 = vector.broadcast %59 : vector<1x32xf32> to vector<32x32xf32>
    %61 = arith.addf %57, %60 : vector<32x32xf32>
    %62 = arith.negf %61 : vector<32x32xf32>
    %63 = math.exp %62 : vector<32x32xf32>
    %cst_49 = arith.constant 1.000000e+00 : f32
    %64 = vector.broadcast %cst_49 : f32 to vector<32x32xf32>
    %65 = arith.addf %64, %63 : vector<32x32xf32>
    %66 = arith.divf %64, %65 : vector<32x32xf32>
    %67 = arith.mulf %38, %6 : vector<32x32xf32>
    %68 = arith.mulf %22, %50 : vector<32x32xf32>
    %69 = arith.addf %67, %68 : vector<32x32xf32>
    %70 = math.tanh %69 : vector<32x32xf32>
    %71 = arith.mulf %66, %70 : vector<32x32xf32>
    %c0_50 = arith.constant 0 : index
    %c0_51 = arith.constant 0 : index
    %72 = vector.load %arg9[%c0_50, %c0_51] : memref<32x32xf32, #tpu.memory_space<vmem>>, vector<32x32xf32>
    tpu.vector_store %arg9[%c0_50, %c0_51], %69 {strides = array<i32>} : memref<32x32xf32, #tpu.memory_space<vmem>>, vector<32x32xf32>,
    %c0_52 = arith.constant 0 : index
    %c0_53 = arith.constant 0 : index
    %73 = vector.load %arg8[%c0_52, %c0_53] : memref<32x32xf32, #tpu.memory_space<vmem>>, vector<32x32xf32>
    tpu.vector_store %arg8[%c0_52, %c0_53], %71 {strides = array<i32>} : memref<32x32xf32, #tpu.memory_space<vmem>>, vector<32x32xf32>,
    %c0_54 = arith.constant 0 : index
    %c0_55 = arith.constant 0 : index
    %74 = vector.load %arg5[%c0_54, %c0_55] : memref<32x4xf32, #tpu.memory_space<vmem>>, vector<32x4xf32>
    %cst_56 = arith.constant dense<0.000000e+00> : vector<32x4xf32>
    %75 = tpu.matmul %71, %74, %cst_56 {dimension_numbers = #tpu.dot_dimension_numbers<[1], [0], [0], [1], [0, 0, 1, 1], [], []>} : vector<32x32xf32>, vector<32x4xf32>, vector<32x4xf32> -> vector<32x4xf32>
    %c0_57 = arith.constant 0 : index
    %c0_58 = arith.constant 0 : index
    %76 = vector.load %arg6[%c0_57, %c0_58] : memref<1x4xf32, #tpu.memory_space<vmem>>, vector<1x4xf32>
    %77 = vector.broadcast %76 : vector<1x4xf32> to vector<32x4xf32>
    %78 = arith.addf %75, %77 : vector<32x4xf32>
    %c0_59 = arith.constant 0 : index
    %c0_60 = arith.constant 0 : index
    %c0_61 = arith.constant 0 : index
    %79 = vector.load %arg7[%c0_59, %c0_60, %c0_61] : memref<1x32x4xf32, #tpu.memory_space<vmem>>, vector<1x32x4xf32>
    %80 = vector.shape_cast %79 : vector<1x32x4xf32> to vector<32x4xf32>
    %81 = vector.shape_cast %78 : vector<32x4xf32> to vector<1x32x4xf32>
    tpu.vector_store %arg7[%c0_59, %c0_60, %c0_61], %81 {strides = array<i32>} : memref<1x32x4xf32, #tpu.memory_space<vmem>>, vector<1x32x4xf32>,
    return
  }
  func.func @transform_0(%arg0: i32) -> (i32, i32, i32) {
    %c0_i32 = arith.constant 0 : i32
    %c0_i32_0 = arith.constant 0 : i32
    %c0_i32_1 = arith.constant 0 : i32
    return %arg0, %c0_i32, %c0_i32_0 : i32, i32, i32
  }
  func.func @transform_1(%arg0: i32) -> (i32, i32, i32) {
    %c0_i32 = arith.constant 0 : i32
    %c0_i32_0 = arith.constant 0 : i32
    %c0_i32_1 = arith.constant 0 : i32
    %c0_i32_2 = arith.constant 0 : i32
    return %c0_i32, %c0_i32_0, %c0_i32_1 : i32, i32, i32
  }
  func.func @transform_2(%arg0: i32) -> (i32, i32, i32) {
    %c0_i32 = arith.constant 0 : i32
    %c0_i32_0 = arith.constant 0 : i32
    %c0_i32_1 = arith.constant 0 : i32
    %c0_i32_2 = arith.constant 0 : i32
    return %c0_i32, %c0_i32_0, %c0_i32_1 : i32, i32, i32
  }
  func.func @transform_3(%arg0: i32) -> (i32, i32, i32) {
    %c0_i32 = arith.constant 0 : i32
    %c0_i32_0 = arith.constant 0 : i32
    %c0_i32_1 = arith.constant 0 : i32
    %c0_i32_2 = arith.constant 0 : i32
    return %c0_i32, %c0_i32_0, %c0_i32_1 : i32, i32, i32
  }
  func.func @transform_4(%arg0: i32) -> (i32, i32) {
    %c0_i32 = arith.constant 0 : i32
    %c0_i32_0 = arith.constant 0 : i32
    %c0_i32_1 = arith.constant 0 : i32
    return %c0_i32, %c0_i32_0 : i32, i32
  }
  func.func @transform_5(%arg0: i32) -> (i32, i32) {
    %c0_i32 = arith.constant 0 : i32
    %c0_i32_0 = arith.constant 0 : i32
    %c0_i32_1 = arith.constant 0 : i32
    return %c0_i32, %c0_i32_0 : i32, i32
  }
  func.func @transform_6(%arg0: i32) -> (i32, i32, i32) {
    %c0_i32 = arith.constant 0 : i32
    %c0_i32_0 = arith.constant 0 : i32
    %c0_i32_1 = arith.constant 0 : i32
    return %arg0, %c0_i32, %c0_i32_0 : i32, i32, i32
  }
}

module attributes {stable_mosaic.version = 11 : i64} {
  func.func @_norm_add_kernel(%arg0: i32, %arg1: i32, %arg2: memref<8x256xf32, #tpu.memory_space<vmem>>, %arg3: memref<8x256xf32, #tpu.memory_space<vmem>>, %arg4: memref<8x1xf32, #tpu.memory_space<vmem>>, %arg5: memref<8x1xf32, #tpu.memory_space<vmem>>, %arg6: memref<8x256xf32, #tpu.memory_space<vmem>>) attributes {dimension_semantics = [#tpu.dimension_semantics<parallel>, #tpu.dimension_semantics<parallel>], iteration_bounds = array<i64: 1, 1>, scalar_prefetch = 0 : i64, scratch_operands = 0 : i64, tpu.core_type = #tpu.core_type<tc>, window_params = [{transform_indices = @transform_0, window_bounds = array<i64: 8, 256>}, {transform_indices = @transform_1, window_bounds = array<i64: 8, 256>}, {transform_indices = @transform_2, window_bounds = array<i64: 8, 1>}, {transform_indices = @transform_3, window_bounds = array<i64: 8, 1>}, {transform_indices = @transform_4, window_bounds = array<i64: 8, 256>}]} {
    %c0 = arith.constant 0 : index
    %c0_0 = arith.constant 0 : index
    %0 = vector.load %arg2[%c0, %c0_0] : memref<8x256xf32, #tpu.memory_space<vmem>>, vector<8x256xf32>
    %c0_1 = arith.constant 0 : index
    %c0_2 = arith.constant 0 : index
    %1 = vector.load %arg4[%c0_1, %c0_2] : memref<8x1xf32, #tpu.memory_space<vmem>>, vector<8x1xf32>
    %2 = vector.broadcast %1 : vector<8x1xf32> to vector<8x256xf32>
    %3 = arith.mulf %0, %2 : vector<8x256xf32>
    %c0_3 = arith.constant 0 : index
    %c0_4 = arith.constant 0 : index
    %4 = vector.load %arg5[%c0_3, %c0_4] : memref<8x1xf32, #tpu.memory_space<vmem>>, vector<8x1xf32>
    %5 = vector.broadcast %4 : vector<8x1xf32> to vector<8x256xf32>
    %6 = arith.addf %3, %5 : vector<8x256xf32>
    %c0_5 = arith.constant 0 : index
    %c0_6 = arith.constant 0 : index
    %7 = vector.load %arg3[%c0_5, %c0_6] : memref<8x256xf32, #tpu.memory_space<vmem>>, vector<8x256xf32>
    %8 = arith.addf %6, %7 : vector<8x256xf32>
    %c0_7 = arith.constant 0 : index
    %c0_8 = arith.constant 0 : index
    %9 = vector.load %arg6[%c0_7, %c0_8] : memref<8x256xf32, #tpu.memory_space<vmem>>, vector<8x256xf32>
    tpu.vector_store %arg6[%c0_7, %c0_8], %8 {strides = array<i32>} : memref<8x256xf32, #tpu.memory_space<vmem>>, vector<8x256xf32>,
    return
  }
  func.func @transform_0(%arg0: i32, %arg1: i32) -> (i32, i32) {
    %c0_i32 = arith.constant 0 : i32
    return %arg0, %arg1 : i32, i32
  }
  func.func @transform_1(%arg0: i32, %arg1: i32) -> (i32, i32) {
    %c0_i32 = arith.constant 0 : i32
    return %arg0, %arg1 : i32, i32
  }
  func.func @transform_2(%arg0: i32, %arg1: i32) -> (i32, i32) {
    %c0_i32 = arith.constant 0 : i32
    %c0_i32_0 = arith.constant 0 : i32
    return %arg0, %c0_i32 : i32, i32
  }
  func.func @transform_3(%arg0: i32, %arg1: i32) -> (i32, i32) {
    %c0_i32 = arith.constant 0 : i32
    %c0_i32_0 = arith.constant 0 : i32
    return %arg0, %c0_i32 : i32, i32
  }
  func.func @transform_4(%arg0: i32, %arg1: i32) -> (i32, i32) {
    %c0_i32 = arith.constant 0 : i32
    return %arg0, %arg1 : i32, i32
  }
}

</mosaic_0001>

<bundles_post_ra>
// kernel: dual_rnn_block.5
= control target key start
LH: loop header
LB: loop body
LE: loop exit
PB: predicated region body
PF: predicated region fallthrough
CT: control target
= control target key end

     0   :  { %v47_v0 = vmov 0   ;;  %s97_s2 = inlined_call_operand.vmem [shape: f32[8,1], index: 2, kind: input, shape index: {}]   ;;  %s98_s3 = inlined_call_operand.vmem [shape: f32[8,1], index: 3, kind: input, shape index: {}]   ;;  %s99_s0 = inlined_call_operand.vmem [shape: f32[8,256], index: 0, kind: input, shape index: {}]   ;;  %s100_s1 = inlined_call_operand.vmem [shape: f32[8,256], index: 1, kind: input, shape index: {}]   ;;  %s101_s4 = inlined_call_operand.vmem [shape: f32[8,256], index: 4, kind: output, shape index: {}]  }
   0x1   :  { %46 = vset.pattern.permute.xlu0 %v47_v0  ;;  %v19_v1 = vld [vmem:[%s97_s2] sm:$0xff]  ;;  %v18_v5 = vld [vmem:[%s99_s0 + $0x8] sm:$0xff] }
   0x2   :  { %22 = vperm.xlu0 %46, %v19_v1   ;;  %v27_v2 = vld [vmem:[%s98_s3] sm:$0xff]  ;;  %v36_v10 = vld [vmem:[%s100_s1 + $0x8] sm:$0xff] }
   0x3   :  { %v17_v4 = vld [vmem:[%s99_s0] sm:$0xff] }
   0x4   :  { %v35_v9 = vld [vmem:[%s100_s1] sm:$0xff] }
   0xa   :  { %30 = vperm.xlu0 %46, %v27_v2  }
  0x74   :  { %v23_v3 = vpop.permute.xlu0 %22 }
  0x75   :  { %v25_v6 = vmul.f32 %v23_v3, %v17_v4  ;;  %v26_v7 = vmul.f32 %v23_v3, %v18_v5 }
  0x7c   :  { %v31_v8 = vpop.permute.xlu0 %30 }
  0x7d   :  { %v33_v11 = vadd.f32 %v31_v8, %v25_v6  ;;  %v34_v12 = vadd.f32 %v31_v8, %v26_v7 }
  0x7f   :  { %v37_v13 = vadd.f32 %v35_v9, %v33_v11  ;;  %v38_v14 = vadd.f32 %v36_v10, %v34_v12 }
  0x81   :  { %39 = vst [vmem:[%s101_s4] sm:$0xff] %v37_v13 }
  0x82   :  { %40 = vst [vmem:[%s101_s4 + $0x8] sm:$0xff] %v38_v14 }

// kernel: dual_rnn_block.4
= control target key start
LH: loop header
LB: loop body
LE: loop exit
PB: predicated region body
PF: predicated region fallthrough
CT: control target
= control target key end

     0   :  { %s1186_s21 = smov 0   ;;  %s1652_s0 = inlined_call_operand.vmem [shape: f32[16,32,4], index: 0, kind: input, shape index: {}]   ;;  %s1653_s1 = inlined_call_operand.vmem [shape: f32[4,4,32], index: 1, kind: input, shape index: {}]   ;;  %s1654_s2 = inlined_call_operand.vmem [shape: f32[4,32,32], index: 2, kind: input, shape index: {}]   ;;  %s1655_s3 = inlined_call_operand.vmem [shape: f32[4,1,32], index: 3, kind: input, shape index: {}]   ;;  %s1656_s4 = inlined_call_operand.vmem [shape: f32[32,4], index: 4, kind: input, shape index: {}]   ;;  %s1657_s5 = inlined_call_operand.vmem [shape: f32[1,4], index: 5, kind: input, shape index: {}]   ;;  %s1658_s6 = inlined_call_operand.vmem [shape: f32[16,32,4], index: 6, kind: output, shape index: {}]  }
   0x1 LB: > { %s977_s22 = sadd.s32 4294967295, %s1148_s21   ;;  %p981_p0 = scmp.ge.s32.totalorder %s1148_s21, 1  ;;  %s1148_s21 = sphi %s1186_s21, %s16_s21  }
   0x2   : > { %p212_p1 = scmp.lt.s32.totalorder %s1148_s21, 17 }
   0x4   : > { %p213_p2 = pnand %p981_p0, %p212_p1 }
   0x5   : > { %p242_p3 = scmp.lt.s32.totalorder (!%p213_p2), %s977_s22, 15  ;;  %p986_p4 = scmp.ne.s32.totalorder (!%p213_p2), %s977_s22, 0 }
   0x6   : > { %216 = sbr.rel (%p213_p2) target bundleno = 391 (0x187), region = 44 }
   0xb   : > { %s243_s23 = scalar_select %p242_p3, %s977_s22, 15 }
   0xc   : > { %255 = sbr.rel (%p986_p4) target bundleno = 26 (0x1a), region = 48 }
   0xd   : > { %s1059_s24 = sshll.u32 %s243_s23, 5 }
   0xe   : > { %s1197_s27 = scalar_lea.vmem %s1652_s0, %s1059_s24  ;;  %s1202_s30 = scalar_lea.vmem %s1658_s6, %s1059_s24 }
  0x11   : > { %vm256_vm0 = vcmask 261120   ;;  %v1150_v0 = vmov 0.0  }
  0x12   : > { %257 = vst.msk [vmem:[#allocation2] sm:$0xff] %vm256_vm0, %v1150_v0 }
  0x13   : > { %258 = vst.msk [vmem:[#allocation2 + $0x8] sm:$0xff] %vm256_vm0, %v1150_v0 }
  0x14   : > { %259 = vst.msk [vmem:[#allocation2 + $0x10] sm:$0xff] %vm256_vm0, %v1150_v0 }
  0x15   : > { %260 = vst.msk [vmem:[#allocation2 + $0x18] sm:$0xff] %vm256_vm0, %v1150_v0 }
  0x16   : > { %261 = vst.msk [vmem:[#allocation3] sm:$0xff] %vm256_vm0, %v1150_v0 }
  0x17   : > { %262 = vst.msk [vmem:[#allocation3 + $0x8] sm:$0xff] %vm256_vm0, %v1150_v0 }
  0x18   : > { %263 = vst.msk [vmem:[#allocation3 + $0x10] sm:$0xff] %vm256_vm0, %v1150_v0 }
  0x19   : > { %264 = vst.msk [vmem:[#allocation3 + $0x18] sm:$0xff] %vm256_vm0, %v1150_v0 }
  0x1a PF: > { %v281_v1 = vld [vmem:[%s1654_s2 + $0x18] sm:$0xff]  ;;  %v277_v2 = vld [vmem:[%s1653_s1] sm:$0xf]  ;;  %vm337_vm1 = vcmask 1043456   ;;  %v1211_v3 = vld [vmem:[%s1197_s27 + $0x10] sm:$0xff]  ;;  %vm324_vm2 = vcmask 31744  }
  0x1b   : > { %307 = vmatpush.msra.mxu0 %v281_v1  ;;  %1062 = vmatpush.msk.msra.mxu2 %vm337_vm1, %v277_v2  ;;  %v1215_v4 = vld [vmem:[%s1197_s27 + $0x18] sm:$0xff]  ;;  %v280_v5 = vld [vmem:[%s1654_s2 + $0x10] sm:$0xff]  ;;  %v279_v7 = vld [vmem:[%s1654_s2 + $0x8] sm:$0xff]  ;;  %vm282_vm3 = vcmask 261120  }
  0x1c   : > { %v1004_v6 = vld [vmem:[%s1654_s2 + $0x38] sm:$0xff]  ;;  %1063 = vmatpush.msk.msra.mxu3 %vm337_vm1, %v277_v2  ;;  %994 = vmatmul.msk.f32.vlgmr.msra.gmra.mxu2 %vm324_vm2, %v1211_v3  ;;  %v1003_v8 = vld [vmem:[%s1654_s2 + $0x30] sm:$0xff]  ;;  %v278_v9 = vld [vmem:[%s1654_s2] sm:$0xff] }
  0x1d   : > { %995 = vmatmul.msk.f32.vlgmr.msra.gmra.mxu3 %vm324_vm2, %v1215_v4  ;;  %308 = vmatpush.msra.mxu0 %v280_v5  ;;  %v1002_v10 = vld [vmem:[%s1654_s2 + $0x28] sm:$0xff]  ;;  %v1000_v11 = vld [vmem:[%s1653_s1 + $0x4] sm:$0xf]  ;;  %v1023_v17 = vld [vmem:[%s1654_s2 + $0x58] sm:$0xff] }
  0x1e   : > { %473 = vmatpush.msrb.mxu2 %v1004_v6  ;;  %1061 = vmatpush.msk.msra.mxu1 %vm337_vm1, %v277_v2  ;;  %v269_v12 = vld [vmem:[#allocation2] sm:$0xff]  ;;  %v266_v13 = vld [vmem:[%s1197_s27 + $0x8] sm:$0xff]  ;;  %v1038_v18 = vld [vmem:[%s1654_s2 + $0x78] sm:$0xff] }
  0x1f   : > { %309 = vmatpush.msra.mxu0 %v279_v7  ;;  %1009 = vmatpush.msk.msrb.mxu3 %vm337_vm1, %v1000_v11  ;;  %v1019_v14 = vld [vmem:[%s1653_s1 + $0x8] sm:$0xf]  ;;  %v1001_v15 = vld [vmem:[%s1654_s2 + $0x20] sm:$0xff]  ;;  %v1034_v19 = vld [vmem:[%s1653_s1 + $0xc] sm:$0xf] }
  0x20   : > { %474 = vmatpush.msrb.mxu2 %v1003_v8  ;;  %v265_v16 = vld [vmem:[%s1197_s27] sm:$0xff]  ;;  %993 = vmatmul.msk.f32.vlgmr.msra.gmra.mxu1 %vm324_vm2, %v266_v13  ;;  %v1022_v20 = vld [vmem:[%s1654_s2 + $0x50] sm:$0xff]  ;;  %v1021_v22 = vld [vmem:[%s1654_s2 + $0x48] sm:$0xff] }
  0x21   : > { %310 = vmatpush.msra.mxu0 %v278_v9  ;;  %1028 = vmatpush.msk.msra.mxu3 %vm337_vm1, %v1019_v14  ;;  %v1037_v21 = vld [vmem:[%s1654_s2 + $0x70] sm:$0xff]  ;;  %v1036_v23 = vld [vmem:[%s1654_s2 + $0x68] sm:$0xff]  ;;  %v1020_v25 = vld [vmem:[%s1654_s2 + $0x40] sm:$0xff] }
  0x22   : > { %475 = vmatpush.msrb.mxu2 %v1002_v10  ;;  %987 = vmatmul.msk.f32.vlgmr.msra.gmra.mxu0 %vm282_vm3, %v269_v12  ;;  %v270_v24 = vld [vmem:[#allocation2 + $0x8] sm:$0xff]  ;;  %v1035_v26 = vld [vmem:[%s1654_s2 + $0x60] sm:$0xff]  ;;  %v271_v27 = vld [vmem:[#allocation2 + $0x10] sm:$0xff] }
  0x23   : > { %991 = vmatpush.msk.msrb.mxu0 %vm337_vm1, %v277_v2  ;;  %626 = vmatpush.msrb.mxu1 %v1023_v17  ;;  %v272_v28 = vld [vmem:[#allocation2 + $0x18] sm:$0xff]  ;;  %v1073_v33 = vld [vmem:[%s1655_s3] ss:$0 sm:$0xff]  ;;  %v1074_v35 = vld [vmem:[%s1655_s3 + $0x1] ss:$0 sm:$0xff] }
  0x24   : > { %476 = vmatpush.msrb.mxu2 %v1001_v15 }
  0x25   : > { %707 = vmatpush.msra.mxu0 %v1038_v18  ;;  %1005 = vmatmul.msk.f32.vlgmr.msrb.gmra.mxu2 %vm282_vm3, %v269_v12 }
  0x26   : > { %1010 = vmatmul.msk.f32.vlgmr.msrb.gmra.mxu3 %vm324_vm2, %v265_v16  ;;  %1043 = vmatpush.msk.msra.mxu2 %vm337_vm1, %v1034_v19 }
  0x27   : > { %627 = vmatpush.msrb.mxu1 %v1022_v20  ;;  %708 = vmatpush.msra.mxu0 %v1037_v21 }
  0x29   : > { %628 = vmatpush.msrb.mxu1 %v1021_v22  ;;  %709 = vmatpush.msra.mxu0 %v1036_v23 }
  0x2a   : > { %988 = vmatmul.msk.f32.gmra.mxu0 %vm282_vm3, %v270_v24 }
  0x2b   : > { %629 = vmatpush.msrb.mxu1 %v1020_v25  ;;  %710 = vmatpush.msra.mxu0 %v1035_v26 }
  0x2c   : > { %1024 = vmatmul.msk.f32.vlgmr.msrb.gmra.mxu1 %vm282_vm3, %v269_v12 }
  0x2d   : > { %1006 = vmatmul.msk.f32.gmra.mxu2 %vm282_vm3, %v270_v24 }
  0x2e   : > { %1011 = vmatmul.msk.f32.gmra.mxu3 %vm324_vm2, %v266_v13 }
  0x32   : > { %989 = vmatmul.msk.f32.gmra.mxu0 %vm282_vm3, %v271_v27 }
  0x34   : > { %1025 = vmatmul.msk.f32.gmra.mxu1 %vm282_vm3, %v270_v24 }
  0x35   : > { %1007 = vmatmul.msk.f32.gmra.mxu2 %vm282_vm3, %v271_v27 }
  0x36   : > { %1012 = vmatmul.msk.f32.gmra.mxu3 %vm324_vm2, %v1211_v3 }
  0x3a   : > { %990 = vmatmul.msk.f32.gmra.mxu0 %vm282_vm3, %v272_v28 }
  0x3c   : > { %1026 = vmatmul.msk.f32.gmra.mxu1 %vm282_vm3, %v271_v27 }
  0x3d   : > { %1008 = vmatmul.msk.f32.gmra.mxu2 %vm282_vm3, %v272_v28 }
  0x3e   : > { %1013 = vmatmul.msk.f32.gmra.mxu3 %vm324_vm2, %v1215_v4 }
  0x42   : > { %992 = vmatmul.msk.f32.vlgmr.msrb.gmra.mxu0 %vm324_vm2, %v265_v16 }
  0x44   : > { %1027 = vmatmul.msk.f32.gmra.mxu1 %vm282_vm3, %v272_v28 }
  0x45   : > { %1044 = vmatmul.msk.f32.vlgmr.msra.gmra.mxu2 %vm324_vm2, %v265_v16 }
  0x46   : > { %1029 = vmatmul.msk.f32.vlgmr.msra.gmra.mxu3 %vm324_vm2, %v265_v16 }
  0x4a   : > { %1039 = vmatmul.msk.f32.vlgmr.msra.gmra.mxu0 %vm282_vm3, %v269_v12 }
  0x4d   : > { %1045 = vmatmul.msk.f32.gmra.mxu2 %vm324_vm2, %v266_v13 }
  0x4e   : > { %1030 = vmatmul.msk.f32.gmra.mxu3 %vm324_vm2, %v266_v13 }
  0x52   : > { %1040 = vmatmul.msk.f32.gmra.mxu0 %vm282_vm3, %v270_v24 }
  0x55   : > { %1046 = vmatmul.msk.f32.gmra.mxu2 %vm324_vm2, %v1211_v3 }
  0x56   : > { %1031 = vmatmul.msk.f32.gmra.mxu3 %vm324_vm2, %v1211_v3 }
  0x5a   : > { %1041 = vmatmul.msk.f32.gmra.mxu0 %vm282_vm3, %v271_v27 }
  0x5d   : > { %1047 = vmatmul.msk.f32.gmra.mxu2 %vm324_vm2, %v1215_v4 }
  0x5e   : > { %1032 = vmatmul.msk.f32.gmra.mxu3 %vm324_vm2, %v1215_v4 }
  0x62   : > { %1042 = vmatmul.msk.f32.gmra.mxu0 %vm282_vm3, %v272_v28 }
  0x9d   : > { %v361_v32 = vpop.f32.mrf.mxu1 }
  0x9f   : > { %v312_v29 = vpop.f32.mrf.mxu0  ;;  %v364_v30 = vpop.f32.mrf.mxu2 }
  0xa0   : > { %v367_v31 = vpop.f32.mrf.mxu3 }
  0xa7   : > { %v315_v34 = vpop.f32.mrf.mxu0 }
  0xa8   : > { %v362_v36 = vadd.f32 %v361_v32, %v315_v34  ;;  %v478_v37 = vpop.f32.mrf.mxu2 }
  0xa9   : > { %v510_v38 = vpop.f32.mrf.mxu3  ;;  %v1342_v10 = vpop.f32.mrf.mxu1 }
  0xaa   : > { %v511_v39 = vadd.f32 %v510_v38, %v478_v37  ;;  %v375_v40 = vadd.f32 %v1073_v33, %v362_v36 }
  0xac   : > { %v527_v41 = vadd.f32 %v1074_v35, %v511_v39  ;;  %v997_v42 = vmul.f32 -1.442695, %v375_v40 }
  0xae   : > { %v1015_v43 = vmul.f32 -1.442695, %v527_v41  ;;  %1078 = vpow2.f32 %v997_v42  ;;  %v1374_v41 = vld [vmem:[%s1655_s3 + $0x3] ss:$0 sm:$0xff] }
  0xaf   : > { %v318_v44 = vpop.f32.mrf.mxu0 }
  0xb0   : > { %1080 = vpow2.f32 %v1015_v43  ;;  %v365_v45 = vadd.f32 %v364_v30, %v318_v44  ;;  %v481_v46 = vpop.f32.mrf.mxu2  ;;  %v872_v30 = vld [vmem:[%s1656_s4 + $0x18] sm:$0xff] }
  0xb1   : > { %v513_v47 = vpop.f32.mrf.mxu3  ;;  %901 = vmatpush.msra.mxu1 %v872_v30 }
  0xb2   : > { %v514_v48 = vadd.f32 %v513_v47, %v481_v46  ;;  %v376_v49 = vadd.f32 %v1073_v33, %v365_v45  ;;  %v870_v46 = vld [vmem:[%s1656_s4 + $0x8] sm:$0xff] }
  0xb4   : > { %v528_v50 = vadd.f32 %v1074_v35, %v514_v48  ;;  %v1079_v51 = vpop.eup %1078  ;;  %v998_v52 = vmul.f32 -1.442695, %v376_v49  ;;  %v634_v49 = vpop.f32.mrf.mxu1 }
  0xb5   : > { %v1325_v54 = vadd.f32 1.0, %v1079_v51 }
  0xb6   : > { %v1081_v53 = vpop.eup %1080  ;;  %v1016_v55 = vmul.f32 -1.442695, %v528_v50  ;;  %1082 = vpow2.f32 %v998_v52 }
  0xb7   : > { %v1327_v56 = vadd.f32 1.0, %v1081_v53  ;;  %1084 = vrcp.f32 %v1325_v54  ;;  %v321_v57 = vpop.f32.mrf.mxu0  ;;  %v420_v23 = vand.u32 2147483648, %v1325_v54  ;;  %v418_v27 = vand.u32 2147483647, %v1325_v54 }
  0xb8   : > { %v368_v58 = vadd.f32 %v367_v31, %v321_v57  ;;  %v484_v59 = vpop.f32.mrf.mxu2  ;;  %vm414_vm4 = vweird.f32 %v1325_v54  ;;  %v871_v31 = vld [vmem:[%s1656_s4 + $0x10] sm:$0xff] }
  0xb9   : > { %1086 = vrcp.f32 %v1327_v56  ;;  %v516_v60 = vpop.f32.mrf.mxu3  ;;  %v558_v21 = vand.u32 2147483648, %v1327_v56  ;;  %vm552_vm5 = vweird.f32 %v1327_v56  ;;  %v421_v42 = vor.u32 1.1754944e-38, %v420_v23  ;;  %902 = vmatpush.msra.mxu1 %v871_v31 }
  0xba   : > { %1088 = vpow2.f32 %v1016_v55  ;;  %v517_v61 = vadd.f32 %v516_v60, %v484_v59  ;;  %v377_v62 = vadd.f32 %v1073_v33, %v368_v58  ;;  %vm1381_vm7 = vcmp.eq.f32.partialorder %v418_v27, 8.507059e+37 }
  0xbb   : > { %v559_v37 = vor.u32 1.1754944e-38, %v558_v21  ;;  %903 = vmatpush.msra.mxu1 %v870_v46  ;;  %v869_v21 = vld [vmem:[%s1656_s4] sm:$0xff] }
  0xbc   : > { %v529_v63 = vadd.f32 %v1074_v35, %v517_v61  ;;  %v1083_v0 = vpop.eup %1082  ;;  %v999_v1 = vmul.f32 -1.442695, %v377_v62 }
  0xbd   : > { %v1331_v2 = vpop.eup %1084  ;;  %v1333_v3 = vadd.f32 1.0, %v1083_v0  ;;  %904 = vmatpush.msra.mxu1 %v869_v21 }
  0xbe   : > { %v1017_v4 = vmul.f32 -1.442695, %v529_v63  ;;  %1090 = vpow2.f32 %v999_v1  ;;  %v410_v7 = vmul.f32 %v1331_v2, %v1325_v54  ;;  %vm415_vm8 = vweird.f32 %v1331_v2 }
  0xbf   : > { %v1335_v5 = vpop.eup %1086  ;;  %1092 = vrcp.f32 %v1333_v3  ;;  %v358_v9 = vpop.f32.mrf.mxu0  ;;  %v435_v50 = vand.u32 2147483648, %v1333_v3  ;;  %v433_v61 = vand.u32 2147483647, %v1333_v3  ;;  %vm1420_vm12 = vmor %vm414_vm4, %vm415_vm8  ;;  %vm429_vm0 = vweird.f32 %v1333_v3 }
  0xc0   : > { %v1089_v6 = vpop.eup %1088  ;;  %v548_v8 = vmul.f32 %v1335_v5, %v1327_v56  ;;  %1094 = vpow2.f32 %v1017_v4  ;;  %v359_v12 = vadd.f32 %v358_v9, %v312_v29  ;;  %v487_v13 = vpop.f32.mrf.mxu2  ;;  %v411_v18 = vsub.f32 1.0, %v410_v7 }
  0xc1   : > { %v1344_v11 = vadd.f32 1.0, %v1089_v6  ;;  %v519_v14 = vpop.f32.mrf.mxu3  ;;  %vm553_vm6 = vweird.f32 %v1335_v5 }
  0xc2   : > { %v549_v15 = vsub.f32 1.0, %v548_v8  ;;  %v520_v16 = vadd.f32 %v519_v14, %v487_v13  ;;  %v374_v17 = vadd.f32 %v1073_v33, %v359_v12  ;;  %v556_v33 = vand.u32 2147483647, %v1327_v56  ;;  %vm1398_vm9 = vmor %vm552_vm5, %vm553_vm6 }
  0xc3   : > { %1096 = vrcp.f32 %v1344_v11  ;;  %v573_v47 = vand.u32 2147483648, %v1344_v11  ;;  %v571_v53 = vand.u32 2147483647, %v1344_v11  ;;  %vm567_vm11 = vweird.f32 %v1344_v11 }
  0xc4   : > { %v530_v19 = vadd.f32 %v1074_v35, %v520_v16  ;;  %v1091_v20 = vpop.eup %1090  ;;  %v996_v22 = vmul.f32 -1.442695, %v374_v17  ;;  %v550_v25 = vmul.f32 %v1335_v5, %v549_v15  ;;  %v412_v35 = vmul.f32 %v1331_v2, %v411_v18  ;;  %v273_v17 = vld [vmem:[#allocation3] sm:$0xff] }
  0xc5   : > { %v1349_v24 = vpop.eup %1092  ;;  %v1353_v29 = vadd.f32 1.0, %v1091_v20  ;;  %vm1402_vm10 = vcmp.eq.f32.partialorder %v556_v33, 8.507059e+37  ;;  %v574_v4 = vor.u32 1.1754944e-38, %v573_v47  ;;  %v1424_v8 = vor.u32 1.1754944e-38, %v435_v50 }
  0xc6   : > { %v1018_v26 = vmul.f32 -1.442695, %v530_v19  ;;  %v1095_v28 = vpop.eup %1094  ;;  %1098 = vpow2.f32 %v996_v22  ;;  %v425_v38 = vmul.f32 %v1349_v24, %v1333_v3  ;;  %v551_v44 = vadd.f32 %v1335_v5, %v550_v25 }
  0xc7   : > { %v1363_v32 = vadd.f32 1.0, %v1095_v28  ;;  %v712_v34 = vpop.f32.mrf.mxu0  ;;  %v413_v52 = vadd.f32 %v1331_v2, %v412_v35  ;;  %vm1439_vm13 = vcmp.eq.f32.partialorder %v571_v53, 8.507059e+37  ;;  %vm430_vm15 = vweird.f32 %v1349_v24  ;;  %v637_v35 = vpop.f32.mrf.mxu1 }
  0xc8   : > { %1100 = vpow2.f32 %v1018_v26  ;;  %v744_v40 = vpop.f32.mrf.mxu2  ;;  %v426_v58 = vsub.f32 1.0, %v425_v38  ;;  %v555_v56 = vsel %vm1398_vm9, %v1335_v5, %v551_v44  ;;  %vm1498_vm6 = vcmp.eq.f32.partialorder %v433_v61, 8.507059e+37 }
  0xc9   : > { %v1367_v36 = vpop.eup %1096  ;;  %v663_v39 = vpop.f32.mrf.mxu3  ;;  %1102 = vrcp.f32 %v1363_v32  ;;  %v745_v48 = vadd.f32 %v744_v40, %v712_v34  ;;  %v417_v54 = vsel %vm1420_vm12, %v1331_v2, %v413_v52  ;;  %v588_v16 = vand.u32 2147483648, %v1363_v32  ;;  %vm1531_vm12 = vmor %vm429_vm0, %vm430_vm15 }
  0xca   : > { %v563_v43 = vmul.f32 %v1367_v36, %v1344_v11  ;;  %1104 = vrcp.f32 %v1353_v29  ;;  %v664_v63 = vadd.f32 %v663_v39, %v1342_v10  ;;  %v1434_v10 = vld [vmem:[%s1655_s3 + $0x2] ss:$0 sm:$0xff]  ;;  %v560_v18 = vsel %vm1402_vm10, %v559_v37, %v555_v56 }
  0xcb   : > { %v761_v60 = vadd.f32 %v1374_v41, %v745_v48  ;;  %v427_v2 = vmul.f32 %v1349_v24, %v426_v58  ;;  %vm568_vm14 = vweird.f32 %v1367_v36  ;;  %v1460_v25 = vsel %vm1381_vm7, %v421_v42, %v417_v54 }
  0xcc   : > { %v564_v51 = vsub.f32 1.0, %v563_v43  ;;  %v1099_v55 = vpop.eup %1098  ;;  %v680_v22 = vadd.f32 %v1434_v10, %v664_v63  ;;  %vm582_vm1 = vweird.f32 %v1363_v32  ;;  %v1469_v28 = vmul.f32 %v560_v18, %v273_v17  ;;  %vm1475_vm4 = vmor %vm567_vm11, %vm568_vm14 }
  0xcd   : > { %v1409_v62 = vadd.f32 1.0, %v1099_v55  ;;  %v1049_v6 = vmul.f32 -1.442695, %v761_v60  ;;  %v1479_v34 = vor.u32 1.1754944e-38, %v588_v16  ;;  %v1482_v37 = vadd.f32 %v1349_v24, %v427_v2 }
  0xce   : > { %v1101_v0 = vpop.eup %1100  ;;  %v565_v1 = vmul.f32 %v1367_v36, %v564_v51  ;;  %v586_v38 = vand.u32 2147483647, %v1363_v32  ;;  %v448_v39 = vand.u32 2147483647, %v1353_v29  ;;  %vm444_vm0 = vweird.f32 %v1353_v29 }
  0xcf   : > { %v1426_v9 = vpop.eup %1102  ;;  %1106 = vrcp.f32 %v1409_v62  ;;  %v1429_v5 = vadd.f32 1.0, %v1101_v0  ;;  %v715_v13 = vpop.f32.mrf.mxu0  ;;  %vm399_vm5 = vweird.f32 %v1409_v62  ;;  %v403_v46 = vand.u32 2147483647, %v1409_v62 }
  0xd0   : > { %v1443_v14 = vpop.eup %1104  ;;  %v578_v15 = vmul.f32 %v1426_v9, %v1363_v32  ;;  %v747_v20 = vpop.f32.mrf.mxu2  ;;  %v566_v26 = vadd.f32 %v1367_v36, %v565_v1  ;;  %vm583_vm7 = vweird.f32 %v1426_v9  ;;  %v405_v55 = vand.u32 2147483648, %v1409_v62  ;;  %v274_v1 = vld [vmem:[#allocation3 + $0x8] sm:$0xff] }
  0xd1   : > { %v666_v19 = vpop.f32.mrf.mxu3  ;;  %1108 = vrcp.f32 %v1429_v5  ;;  %v1466_v27 = vmul.f32 %v1443_v14, %v1353_v29  ;;  %v748_v31 = vadd.f32 %v747_v20, %v715_v13  ;;  %vm1511_vm8 = vcmp.eq.f32.partialorder %v586_v38, 8.507059e+37 }
  0xd2   : > { %v579_v23 = vsub.f32 1.0, %v578_v15  ;;  %1110 = vpow2.f32 %v1049_v6  ;;  %v667_v30 = vadd.f32 %v666_v19, %v634_v49  ;;  %v570_v11 = vsel %vm1475_vm4, %v1367_v36, %v566_v26 }
  0xd3   : > { %1112 = vtanh.f32 %v680_v22  ;;  %v762_v43 = vadd.f32 %v1374_v41, %v748_v31  ;;  %v441_v36 = vsub.f32 1.0, %v1466_v27  ;;  %v575_v57 = vsel %vm1439_vm13, %v574_v4, %v570_v11  ;;  %vm1540_vm13 = vmor %vm582_vm1, %vm583_vm7  ;;  %v640_v27 = vpop.f32.mrf.mxu1 }
  0xd4   : > { %v681_v42 = vadd.f32 %v1434_v10, %v667_v30  ;;  %v580_v44 = vmul.f32 %v1426_v9, %v579_v23  ;;  %vm597_vm10 = vweird.f32 %v1429_v5  ;;  %v603_v54 = vand.u32 2147483648, %v1429_v5 }
  0xd5   : > { %v1486_v40 = vpop.eup %1106  ;;  %v1050_v49 = vmul.f32 -1.442695, %v762_v43  ;;  %vm1522_vm11 = vcmp.eq.f32.partialorder %v403_v46, 8.507059e+37  ;;  %v406_v18 = vor.u32 1.1754944e-38, %v405_v55  ;;  %v432_v3 = vsel %vm1531_vm12, %v1349_v24, %v1482_v37 }
  0xd6   : > { %v395_v45 = vmul.f32 %v1486_v40, %v1409_v62  ;;  %1114 = vtanh.f32 %v681_v42  ;;  %vm400_vm9 = vweird.f32 %v1486_v40  ;;  %v581_v6 = vadd.f32 %v1426_v9, %v580_v44  ;;  %v275_v42 = vld [vmem:[#allocation3 + $0x10] sm:$0xff] }
  0xd7   : > { %v1502_v48 = vpop.eup %1108  ;;  %v718_v50 = vpop.f32.mrf.mxu0  ;;  %1116 = vpow2.f32 %v1050_v49  ;;  %vm445_vm14 = vweird.f32 %v1443_v14  ;;  %vm401_vm15 = vmor %vm399_vm5, %vm400_vm9  ;;  %v842_v32 = vmul.f32 %v575_v57, %v274_v1  ;;  %v442_v21 = vmul.f32 %v1443_v14, %v441_v36  ;;  %v276_v1 = vld [vmem:[#allocation3 + $0x18] sm:$0xff] }
  0xd8   : > { %v1111_v51 = vpop.eup %1110  ;;  %v396_v52 = vsub.f32 1.0, %v395_v45  ;;  %v593_v53 = vmul.f32 %v1502_v48, %v1429_v5  ;;  %v750_v60 = vpop.f32.mrf.mxu2  ;;  %v585_v23 = vsel %vm1540_vm13, %v1426_v9, %v581_v6  ;;  %vm598_vm1 = vweird.f32 %v1502_v48 }
  0xd9   : > { %v669_v59 = vpop.f32.mrf.mxu3  ;;  %v1516_v61 = vadd.f32 1.0, %v1111_v51  ;;  %v751_v7 = vadd.f32 %v750_v60, %v718_v50  ;;  %v1113_v4 = vpop.eup %1112  ;;  %v604_v62 = vor.u32 1.1754944e-38, %v603_v54  ;;  %v437_v33 = vsel %vm1498_vm6, %v1424_v8, %v432_v3  ;;  %vm1591_vm4 = vmor %vm597_vm10, %vm598_vm1 }
  0xda   : > { %v670_v56 = vadd.f32 %v669_v59, %v637_v35  ;;  %v594_v63 = vsub.f32 1.0, %v593_v53  ;;  %v397_v0 = vmul.f32 %v1486_v40, %v396_v52  ;;  %v590_v43 = vsel %vm1511_vm8, %v1479_v34, %v585_v23  ;;  %vm1607_vm6 = vmor %vm444_vm0, %vm445_vm14 }
  0xdb   : > { %1118 = vrcp.f32 %v1516_v61  ;;  %v763_v19 = vadd.f32 %v1374_v41, %v751_v7  ;;  %v443_v36 = vadd.f32 %v1443_v14, %v442_v21  ;;  %v450_v50 = vand.u32 2147483648, %v1353_v29 }
  0xdc   : > { %v682_v15 = vadd.f32 %v1434_v10, %v670_v56  ;;  %v398_v17 = vadd.f32 %v1486_v40, %v397_v0  ;;  %v1115_v20 = vpop.eup %1114  ;;  %v595_v2 = vmul.f32 %v1502_v48, %v594_v63  ;;  %v601_v34 = vand.u32 2147483647, %v1429_v5 }
  0xdd   : > { %v846_v24 = vmul.f32 %v1115_v20, %v1460_v25  ;;  %v1051_v26 = vmul.f32 -1.442695, %v763_v19  ;;  %v1117_v30 = vpop.eup %1116  ;;  %v843_v55 = vmul.f32 %v590_v43, %v275_v42  ;;  %v792_v58 = vand.u32 2147483648, %v1516_v61 }
  0xde   : > { %1120 = vtanh.f32 %v682_v15  ;;  %v402_v22 = vsel %vm401_vm15, %v1486_v40, %v398_v17  ;;  %v1571_v9 = vadd.f32 1.0, %v1117_v30  ;;  %v596_v44 = vadd.f32 %v1502_v48, %v595_v2 }
  0xdf   : > { %v407_v31 = vsel %vm1522_vm11, %v406_v18, %v402_v22  ;;  %v721_v25 = vpop.f32.mrf.mxu0  ;;  %v1569_v37 = vadd.f32 %v846_v24, %v842_v32  ;;  %1122 = vpow2.f32 %v1051_v26  ;;  %v790_v56 = vand.u32 2147483647, %v1516_v61 }
  0xe0   : > { %v845_v35 = vmul.f32 %v1113_v4, %v407_v31  ;;  %v753_v40 = vpop.f32.mrf.mxu2  ;;  %1124 = vrcp.f32 %v1571_v9  ;;  %vm602_vm7 = vcmp.eq.f32.partialorder %v601_v34, 8.507059e+37  ;;  %vm786_vm8 = vweird.f32 %v1516_v61 }
  0xe1   : > { %v672_v38 = vpop.f32.mrf.mxu3  ;;  %v1119_v11 = vpop.eup %1118  ;;  %v754_v46 = vadd.f32 %v753_v40, %v721_v25  ;;  %862 = vst.msk [vmem:[#allocation3 + $0x8] sm:$0xff] %vm282_vm3, %v1569_v37  ;;  %v447_v6 = vsel %vm1607_vm6, %v1443_v14, %v443_v36  ;;  %v451_v54 = vor.u32 1.1754944e-38, %v450_v50  ;;  %v793_v12 = vor.u32 1.1754944e-38, %v792_v58 }
  0xe2   : > { %v673_v45 = vadd.f32 %v672_v38, %v640_v27  ;;  %v849_v8 = vadd.f32 %v845_v35, %v1469_v28  ;;  %v782_v47 = vmul.f32 %v1119_v11, %v1516_v61  ;;  %vm787_vm5 = vweird.f32 %v1119_v11 }
  0xe3   : > { %v764_v52 = vadd.f32 %v1374_v41, %v754_v46  ;;  %v600_v41 = vsel %vm1591_vm4, %v1502_v48, %v596_v44  ;;  %vm788_vm9 = vmor %vm786_vm8, %vm787_vm5  ;;  %vm449_vm10 = vcmp.eq.f32.partialorder %v448_v39, 8.507059e+37  ;;  %vm791_vm11 = vcmp.eq.f32.partialorder %v790_v56, 8.507059e+37 }
  0xe4   : > { %v1121_v49 = vpop.eup %1120  ;;  %v683_v51 = vadd.f32 %v1434_v10, %v673_v45  ;;  %1126 = vtanh.f32 %v849_v8  ;;  %861 = vst.msk [vmem:[#allocation3] sm:$0xff] %vm282_vm3, %v849_v8  ;;  %v783_v53 = vsub.f32 1.0, %v782_v47  ;;  %v605_v7 = vsel %vm602_vm7, %v604_v62, %v600_v41 }
  0xe5   : > { %v847_v57 = vmul.f32 %v1121_v49, %v437_v33  ;;  %v1052_v10 = vmul.f32 -1.442695, %v764_v52  ;;  %v1123_v59 = vpop.eup %1122  ;;  %v452_v17 = vsel %vm449_vm10, %v451_v54, %v447_v6  ;;  %v844_v18 = vmul.f32 %v605_v7, %v276_v1 }
  0xe6   : > { %1128 = vtanh.f32 %v683_v51  ;;  %v784_v5 = vmul.f32 %v1119_v11, %v783_v53  ;;  %v1601_v63 = vadd.f32 1.0, %v1123_v59  ;;  %v1125_v48 = vpop.eup %1124  ;;  %v807_v2 = vand.u32 2147483648, %v1571_v9 }
  0xe7   : > { %v851_v60 = vadd.f32 %v847_v57, %v843_v55  ;;  %1130 = vpow2.f32 %v1052_v10  ;;  %v797_v13 = vmul.f32 %v1125_v48, %v1571_v9  ;;  %vm802_vm12 = vweird.f32 %v1125_v48  ;;  %v1077_v55 = vld [vmem:[%s1657_s5] ss:$0 sm:$0xff] }
  0xe8   : > { %v785_v4 = vadd.f32 %v1119_v11, %v784_v5  ;;  %1132 = vrcp.f32 %v1601_v63  ;;  %v805_v22 = vand.u32 2147483647, %v1571_v9  ;;  %vm801_vm13 = vweird.f32 %v1571_v9 }
  0xe9   : > { %863 = vst.msk [vmem:[#allocation3 + $0x10] sm:$0xff] %vm282_vm3, %v851_v60  ;;  %v798_v3 = vsub.f32 1.0, %v797_v13  ;;  %1134 = vtanh.f32 %v1569_v37  ;;  %vm803_vm14 = vmor %vm801_vm13, %vm802_vm12  ;;  %v808_v26 = vor.u32 1.1754944e-38, %v807_v2  ;;  %v822_v35 = vand.u32 2147483648, %v1601_v63 }
  0xea   : > { %v1127_v15 = vpop.eup %1126  ;;  %v789_v61 = vsel %vm788_vm9, %v1119_v11, %v785_v4  ;;  %vm806_vm15 = vcmp.eq.f32.partialorder %v805_v22, 8.507059e+37  ;;  %v820_v9 = vand.u32 2147483647, %v1601_v63  ;;  %vm816_vm1 = vweird.f32 %v1601_v63 }
  0xeb   : > { %v794_v14 = vsel %vm791_vm11, %v793_v12, %v789_v61  ;;  %v799_v21 = vmul.f32 %v1125_v48, %v798_v3  ;;  %v823_v11 = vor.u32 1.1754944e-38, %v822_v35 }
  0xec   : > { %v1129_v16 = vpop.eup %1128  ;;  %v857_v20 = vmul.f32 %v1127_v15, %v794_v14  ;;  %vm821_vm5 = vcmp.eq.f32.partialorder %v820_v9, 8.507059e+37 }
  0xed   : > { %v848_v19 = vmul.f32 %v1129_v16, %v452_v17  ;;  %v1131_v32 = vpop.eup %1130  ;;  %v800_v23 = vadd.f32 %v1125_v48, %v799_v21 }
  0xee   : > { %v780_v39 = vadd.f32 1.0, %v1131_v32  ;;  %865 = vst.msk [vmem:[#allocation2] sm:$0xff] %vm282_vm3, %v857_v20  ;;  %1053 = vmatmul.msk.f32.vlgmr.msra.gmra.mxu1 %vm282_vm3, %v857_v20  ;;  %v1133_v24 = vpop.eup %1132 }
  0xef   : > { %v852_v29 = vadd.f32 %v848_v19, %v844_v18  ;;  %v812_v27 = vmul.f32 %v1133_v24, %v1601_v63  ;;  %v804_v30 = vsel %vm803_vm14, %v1125_v48, %v800_v23  ;;  %v1135_v62 = vpop.eup %1134  ;;  %vm817_vm0 = vweird.f32 %v1133_v24 }
  0xf0   : > { %1136 = vrcp.f32 %v780_v39  ;;  %v809_v31 = vsel %vm806_vm15, %v808_v26, %v804_v30  ;;  %vm818_vm4 = vmor %vm816_vm1, %vm817_vm0  ;;  %v837_v47 = vand.u32 2147483648, %v780_v39  ;;  %v835_v49 = vand.u32 2147483647, %v780_v39 }
  0xf1   : > { %864 = vst.msk [vmem:[#allocation3 + $0x18] sm:$0xff] %vm282_vm3, %v852_v29  ;;  %v813_v33 = vsub.f32 1.0, %v812_v27  ;;  %v858_v25 = vmul.f32 %v1135_v62, %v809_v31  ;;  %1138 = vtanh.f32 %v851_v60  ;;  %vm831_vm7 = vweird.f32 %v780_v39 }
  0xf2   : > { %1140 = vtanh.f32 %v852_v29  ;;  %v838_v34 = vor.u32 1.1754944e-38, %v837_v47  ;;  %vm836_vm9 = vcmp.eq.f32.partialorder %v835_v49, 8.507059e+37 }
  0xf3   : > { %v814_v37 = vmul.f32 %v1133_v24, %v813_v33  ;;  %866 = vst.msk [vmem:[#allocation2 + $0x8] sm:$0xff] %vm282_vm3, %v858_v25 }
  0xf5   : > { %v815_v40 = vadd.f32 %v1133_v24, %v814_v37 }
  0xf6   : > { %v1137_v38 = vpop.eup %1136  ;;  %1054 = vmatmul.msk.f32.gmra.mxu1 %vm282_vm3, %v858_v25 }
  0xf7   : > { %v827_v42 = vmul.f32 %v1137_v38, %v780_v39  ;;  %v819_v43 = vsel %vm818_vm4, %v1133_v24, %v815_v40  ;;  %v1139_v44 = vpop.eup %1138  ;;  %vm832_vm6 = vweird.f32 %v1137_v38 }
  0xf8   : > { %v824_v45 = vsel %vm821_vm5, %v823_v11, %v819_v43  ;;  %vm833_vm8 = vmor %vm831_vm7, %vm832_vm6  ;;  %v1141_v52 = vpop.eup %1140 }
  0xf9   : > { %v828_v46 = vsub.f32 1.0, %v827_v42  ;;  %v859_v8 = vmul.f32 %v1139_v44, %v824_v45 }
  0xfb   : > { %v829_v36 = vmul.f32 %v1137_v38, %v828_v46  ;;  %867 = vst.msk [vmem:[#allocation2 + $0x10] sm:$0xff] %vm282_vm3, %v859_v8 }
  0xfd   : > { %v830_v50 = vadd.f32 %v1137_v38, %v829_v36 }
  0xfe   : > { %1055 = vmatmul.msk.f32.gmra.mxu1 %vm282_vm3, %v859_v8 }
  0xff   : > { %v834_v51 = vsel %vm833_vm8, %v1137_v38, %v830_v50 }
 0x100   : > { %v839_v28 = vsel %vm836_vm9, %v838_v34, %v834_v51 }
 0x101   : > { %v860_v53 = vmul.f32 %v1141_v52, %v839_v28 }
 0x103   : > { %868 = vst.msk [vmem:[#allocation2 + $0x18] sm:$0xff] %vm282_vm3, %v860_v53 }
 0x106   : > { %1056 = vmatmul.msk.f32.gmra.mxu1 %vm282_vm3, %v860_v53 }
 0x16b   : > { %v906_v57 = vpop.f32.mrf.mxu1 }
 0x16c   : > { %v907_v58 = vadd.f32 %v1077_v55, %v906_v57 }
 0x16e   : > { %918 = vst.msk [vmem:[%s1202_s30] sm:$0xff] %vm324_vm2, %v907_v58 }
 0x173   : > { %v909_v41 = vpop.f32.mrf.mxu1 }
 0x174   : > { %v910_v10 = vadd.f32 %v1077_v55, %v909_v41 }
 0x176   : > { %919 = vst.msk [vmem:[%s1202_s30 + $0x8] sm:$0xff] %vm324_vm2, %v910_v10 }
 0x17b   : > { %v912_v59 = vpop.f32.mrf.mxu1 }
 0x17c   : > { %v913_v5 = vadd.f32 %v1077_v55, %v912_v59 }
 0x17e   : > { %920 = vst.msk [vmem:[%s1202_s30 + $0x10] sm:$0xff] %vm324_vm2, %v913_v5 }
 0x183   : > { %v915_v60 = vpop.f32.mrf.mxu1 }
 0x184   : > { %v916_v56 = vadd.f32 %v1077_v55, %v915_v60 }
 0x186   : > { %921 = vst.msk [vmem:[%s1202_s30 + $0x18] sm:$0xff] %vm324_vm2, %v916_v56 }
 0x187 PF: > { %s16_s21 = sadd.s32 1, %s1148_s21  }
 0x188   : > { %p13_p5 = scmp.ge.s32.totalorder %s16_s21, 18  }
 0x18a   :  { %15 = sbr.rel (!%p13_p5) target bundleno = 1 (0x1), region = 87 }

</bundles_post_ra>
